<compile_context>
chip_gen: v5e
topology: v5e:2x2
jax: 0.10.0
libtpu: 0.0.40
codegen_flags: <defaults>
</compile_context>

<pallas_src>
import functools

import jax
import jax.numpy as jnp
from jax.experimental import pallas as pl
from jax.experimental.pallas import tpu as pltpu


K_PAD = 896          # 7 * 128 : padded input-feature dim (784 -> 896)
OUT_PAD = 128        # lane-dense output width (10 -> 128)
H1, H2, OUT = 32, 16, 10


def _round_up(x, m):
    return (x + m - 1) // m * m


def mlp_kernel(x_ref, w1_ref, b1_ref, w2_ref, b2_ref, w3_ref, b3_ref, o_ref):
    # Layer 1: bf16 x bf16 -> f32 accumulate on the MXU; bias/ReLU on the f32 result.
    x = x_ref[...]                                                     # (TB, 896) bf16
    h1 = jnp.dot(x, w1_ref[...], preferred_element_type=jnp.float32) + b1_ref[...]
    h1 = jnp.maximum(h1, 0.0)                                          # (TB, 32) f32
    # Layers 2/3 are tiny and VMEM-resident; keep them in f32.
    h2 = jnp.dot(h1, w2_ref[...], preferred_element_type=jnp.float32) + b2_ref[...]
    h2 = jnp.maximum(h2, 0.0)                                          # (TB, 16) f32
    out = jnp.dot(h2, w3_ref[...], preferred_element_type=jnp.float32) + b3_ref[...]
    o_ref[...] = out.astype(o_ref.dtype)                               # (TB, 128) lane-dense


def prepare_params(params):
    """Pad / cast the raw (PyTorch-equivalent) params for the kernel. Done once."""
    w1, b1, w2, b2, w3, b3 = params
    # K padding for layer 1 (zeros -> no effect on the result), cast to bf16.
    w1p = jnp.zeros((K_PAD, H1), jnp.float32).at[:w1.shape[0]].set(w1).astype(jnp.bfloat16)
    # Lane-dense padding for layer 3 output (columns 10..127 are zero and sliced off).
    w3p = jnp.zeros((H2, OUT_PAD), jnp.float32).at[:, :OUT].set(w3)
    b3p = jnp.zeros((1, OUT_PAD), jnp.float32).at[:, :OUT].set(b3)
    return (w1p, b1, w2, b2, w3p, b3p)


@functools.partial(jax.jit, static_argnames=())
def mlp_forward(x_nchw, prepared):
    w1, b1, w2, b2, w3, b3 = prepared
    B = x_nchw.shape[0]

    # Flatten NCHW -> (B, 784), same ordering as torch.nn.Flatten, cast to bf16.
    x2d = x_nchw.reshape(B, -1).astype(jnp.bfloat16)
    K = x2d.shape[1]

    # Batch tile: multiple of 8 sublanes; cap at 512 rows (well under VMEM on v5e/v6e/v7x:
    # double-buffered 512x896 bf16 x-tile ~1.8 MiB + ~0.1 MiB resident weights).
    TB = min(512, _round_up(B, 8))
    B_pad = _round_up(B, TB)
    num_tiles = B_pad // TB

    # Zero-pad batch rows (sliced off below) and K columns (zeros, no effect).
    xp = jnp.pad(x2d, ((0, B_pad - B), (0, K_PAD - K)))

    resident = lambda arr: pl.BlockSpec(arr.shape, lambda i: (0, 0))

    flops = 2 * B_pad * (K_PAD * H1 + H1 * H2 + H2 * OUT_PAD)
    bytes_accessed = (
        xp.size * xp.dtype.itemsize
        + sum(a.size * a.dtype.itemsize for a in (w1, b1, w2, b2, w3, b3))
        + B_pad * OUT_PAD * 4
    )

    out = pl.pallas_call(
        mlp_kernel,
        out_shape=jax.ShapeDtypeStruct((B_pad, OUT_PAD), jnp.float32),
        grid=(num_tiles,),
        in_specs=[
            pl.BlockSpec((TB, K_PAD), lambda i: (i, 0)),   # streamed, double-buffered
            resident(w1), resident(b1),
            resident(w2), resident(b2),
            resident(w3), resident(b3),
        ],
        out_specs=pl.BlockSpec((TB, OUT_PAD), lambda i: (i, 0)),
        compiler_params=pltpu.CompilerParams(
            dimension_semantics=("parallel",),             # megacore-shard batch on v7x
        ),
        cost_estimate=pl.CostEstimate(
            flops=flops, transcendentals=0, bytes_accessed=bytes_accessed
        ),
    )(xp, w1, b1, w2, b2, w3, b3)

    return out[:B, :OUT]


def init_params(key):
    # Deterministic init mimicking PyTorch Linear default (uniform +/- 1/sqrt(fan_in)).
    def linear(key, fan_in, fan_out):
        kw, kb = jax.random.split(key)
        bound = 1.0 / jnp.sqrt(fan_in)
        w = jax.random.uniform(kw, (fan_in, fan_out), jnp.float32, -bound, bound)
        b = jax.random.uniform(kb, (1, fan_out), jnp.float32, -bound, bound)
        return w, b

    k1, k2, k3 = jax.random.split(key, 3)
    w1, b1 = linear(k1, 28 * 28, H1)
    w2, b2 = linear(k2, H1, H2)
    w3, b3 = linear(k3, H2, OUT)
    return (w1, b1, w2, b2, w3, b3)


if __name__ == "__main__":
    key = jax.random.PRNGKey(0)
    kx, kp = jax.random.split(key)

    B = 8
    x = jax.random.normal(kx, (B, 1, 28, 28), jnp.float32)  # NCHW, MNIST-shaped
    params = init_params(kp)
    prepared = prepare_params(params)

    out = mlp_forward(x, prepared)
    out = jax.block_until_ready(out)

    # Pure-JAX reference (same math; layer 1 inputs bf16-cast to match the kernel's feed dtype).
    w1, b1, w2, b2, w3, b3 = params
    xf = x.reshape(B, -1)
    x_bf = xf.astype(jnp.bfloat16).astype(jnp.float32)
    w1_bf = w1.astype(jnp.bfloat16).astype(jnp.float32)
    ref = jnp.maximum(x_bf @ w1_bf + b1, 0.0)
    ref = jnp.maximum(ref @ w2 + b2, 0.0)
    ref = ref @ w3 + b3

    assert out.shape == (B, 10)
    assert jnp.allclose(out, ref, atol=2e-3, rtol=2e-3), float(jnp.max(jnp.abs(out - ref)))

    print("KERNEL_OK")
</pallas_src>

<mosaic_0001>
module attributes {stable_mosaic.version = 11 : i64} {
  func.func @mlp_kernel(%arg0: i32, %arg1: memref<8x896xbf16, #tpu.memory_space<vmem>>, %arg2: memref<896x32xbf16, #tpu.memory_space<vmem>>, %arg3: memref<1x32xf32, #tpu.memory_space<vmem>>, %arg4: memref<32x16xf32, #tpu.memory_space<vmem>>, %arg5: memref<1x16xf32, #tpu.memory_space<vmem>>, %arg6: memref<16x128xf32, #tpu.memory_space<vmem>>, %arg7: memref<1x128xf32, #tpu.memory_space<vmem>>, %arg8: memref<8x128xf32, #tpu.memory_space<vmem>>) attributes {dimension_semantics = [#tpu.dimension_semantics<parallel>], iteration_bounds = array<i64: 1>, scalar_prefetch = 0 : i64, scratch_operands = 0 : i64, tpu.core_type = #tpu.core_type<tc>, window_params = [{transform_indices = @transform_0, window_bounds = array<i64: 8, 896>}, {pipeline_mode = #tpu.pipeline_mode<synchronous>, transform_indices = @transform_1, window_bounds = array<i64: 896, 32>}, {pipeline_mode = #tpu.pipeline_mode<synchronous>, transform_indices = @transform_2, window_bounds = array<i64: 1, 32>}, {pipeline_mode = #tpu.pipeline_mode<synchronous>, transform_indices = @transform_3, window_bounds = array<i64: 32, 16>}, {pipeline_mode = #tpu.pipeline_mode<synchronous>, transform_indices = @transform_4, window_bounds = array<i64: 1, 16>}, {pipeline_mode = #tpu.pipeline_mode<synchronous>, transform_indices = @transform_5, window_bounds = array<i64: 16, 128>}, {pipeline_mode = #tpu.pipeline_mode<synchronous>, transform_indices = @transform_6, window_bounds = array<i64: 1, 128>}, {transform_indices = @transform_7, window_bounds = array<i64: 8, 128>}]} {
    %c0 = arith.constant 0 : index
    %c0_0 = arith.constant 0 : index
    %0 = vector.load %arg1[%c0, %c0_0] : memref<8x896xbf16, #tpu.memory_space<vmem>>, vector<8x896xbf16>
    %c0_1 = arith.constant 0 : index
    %c0_2 = arith.constant 0 : index
    %1 = vector.load %arg2[%c0_1, %c0_2] : memref<896x32xbf16, #tpu.memory_space<vmem>>, vector<896x32xbf16>
    %cst = arith.constant dense<0.000000e+00> : vector<8x32xf32>
    %2 = tpu.matmul %0, %1, %cst {dimension_numbers = #tpu.dot_dimension_numbers<[1], [0], [0], [1], [0, 0, 1, 1], [], []>} : vector<8x896xbf16>, vector<896x32xbf16>, vector<8x32xf32> -> vector<8x32xf32>
    %c0_3 = arith.constant 0 : index
    %c0_4 = arith.constant 0 : index
    %3 = vector.load %arg3[%c0_3, %c0_4] : memref<1x32xf32, #tpu.memory_space<vmem>>, vector<1x32xf32>
    %4 = vector.broadcast %3 : vector<1x32xf32> to vector<8x32xf32>
    %5 = arith.addf %2, %4 : vector<8x32xf32>
    %cst_5 = arith.constant 0.000000e+00 : f32
    %6 = vector.broadcast %cst_5 : f32 to vector<8x32xf32>
    %7 = arith.maximumf %5, %6 : vector<8x32xf32>
    %c0_6 = arith.constant 0 : index
    %c0_7 = arith.constant 0 : index
    %8 = vector.load %arg4[%c0_6, %c0_7] : memref<32x16xf32, #tpu.memory_space<vmem>>, vector<32x16xf32>
    %cst_8 = arith.constant dense<0.000000e+00> : vector<8x16xf32>
    %9 = tpu.matmul %7, %8, %cst_8 {dimension_numbers = #tpu.dot_dimension_numbers<[1], [0], [0], [1], [0, 0, 1, 1], [], []>} : vector<8x32xf32>, vector<32x16xf32>, vector<8x16xf32> -> vector<8x16xf32>
    %c0_9 = arith.constant 0 : index
    %c0_10 = arith.constant 0 : index
    %10 = vector.load %arg5[%c0_9, %c0_10] : memref<1x16xf32, #tpu.memory_space<vmem>>, vector<1x16xf32>
    %11 = vector.broadcast %10 : vector<1x16xf32> to vector<8x16xf32>
    %12 = arith.addf %9, %11 : vector<8x16xf32>
    %cst_11 = arith.constant 0.000000e+00 : f32
    %13 = vector.broadcast %cst_11 : f32 to vector<8x16xf32>
    %14 = arith.maximumf %12, %13 : vector<8x16xf32>
    %c0_12 = arith.constant 0 : index
    %c0_13 = arith.constant 0 : index
    %15 = vector.load %arg6[%c0_12, %c0_13] : memref<16x128xf32, #tpu.memory_space<vmem>>, vector<16x128xf32>
    %cst_14 = arith.constant dense<0.000000e+00> : vector<8x128xf32>
    %16 = tpu.matmul %14, %15, %cst_14 {dimension_numbers = #tpu.dot_dimension_numbers<[1], [0], [0], [1], [0, 0, 1, 1], [], []>} : vector<8x16xf32>, vector<16x128xf32>, vector<8x128xf32> -> vector<8x128xf32>
    %c0_15 = arith.constant 0 : index
    %c0_16 = arith.constant 0 : index
    %17 = vector.load %arg7[%c0_15, %c0_16] : memref<1x128xf32, #tpu.memory_space<vmem>>, vector<1x128xf32>
    %18 = vector.broadcast %17 : vector<1x128xf32> to vector<8x128xf32>
    %19 = arith.addf %16, %18 : vector<8x128xf32>
    %c0_17 = arith.constant 0 : index
    %c0_18 = arith.constant 0 : index
    %20 = vector.load %arg8[%c0_17, %c0_18] : memref<8x128xf32, #tpu.memory_space<vmem>>, vector<8x128xf32>
    tpu.vector_store %arg8[%c0_17, %c0_18], %19 {strides = array<i32>} : memref<8x128xf32, #tpu.memory_space<vmem>>, vector<8x128xf32>,
    return
  }
  func.func @transform_0(%arg0: i32) -> (i32, i32) {
    %c0_i32 = arith.constant 0 : i32
    %c0_i32_0 = arith.constant 0 : i32
    return %arg0, %c0_i32 : i32, i32
  }
  func.func @transform_1(%arg0: i32) -> (i32, i32) {
    %c0_i32 = arith.constant 0 : i32
    %c0_i32_0 = arith.constant 0 : i32
    %c0_i32_1 = arith.constant 0 : i32
    return %c0_i32, %c0_i32_0 : i32, i32
  }
  func.func @transform_2(%arg0: i32) -> (i32, i32) {
    %c0_i32 = arith.constant 0 : i32
    %c0_i32_0 = arith.constant 0 : i32
    %c0_i32_1 = arith.constant 0 : i32
    return %c0_i32, %c0_i32_0 : i32, i32
  }
  func.func @transform_3(%arg0: i32) -> (i32, i32) {
    %c0_i32 = arith.constant 0 : i32
    %c0_i32_0 = arith.constant 0 : i32
    %c0_i32_1 = arith.constant 0 : i32
    return %c0_i32, %c0_i32_0 : i32, i32
  }
  func.func @transform_4(%arg0: i32) -> (i32, i32) {
    %c0_i32 = arith.constant 0 : i32
    %c0_i32_0 = arith.constant 0 : i32
    %c0_i32_1 = arith.constant 0 : i32
    return %c0_i32, %c0_i32_0 : i32, i32
  }
  func.func @transform_5(%arg0: i32) -> (i32, i32) {
    %c0_i32 = arith.constant 0 : i32
    %c0_i32_0 = arith.constant 0 : i32
    %c0_i32_1 = arith.constant 0 : i32
    return %c0_i32, %c0_i32_0 : i32, i32
  }
  func.func @transform_6(%arg0: i32) -> (i32, i32) {
    %c0_i32 = arith.constant 0 : i32
    %c0_i32_0 = arith.constant 0 : i32
    %c0_i32_1 = arith.constant 0 : i32
    return %c0_i32, %c0_i32_0 : i32, i32
  }
  func.func @transform_7(%arg0: i32) -> (i32, i32) {
    %c0_i32 = arith.constant 0 : i32
    %c0_i32_0 = arith.constant 0 : i32
    return %arg0, %c0_i32 : i32, i32
  }
}

</mosaic_0001>

<bundles_post_ra>
// kernel: mlp_forward.1
= control target key start
LH: loop header
LB: loop body
LE: loop exit
PB: predicated region body
PF: predicated region fallthrough
CT: control target
= control target key end

     0   :  { %s1243_s0 = inlined_call_operand.vmem [shape: bf16[8,896], index: 0, kind: input, shape index: {}]   ;;  %s1244_s1 = inlined_call_operand.vmem [shape: bf16[896,32], index: 1, kind: input, shape index: {}]   ;;  %s1245_s2 = inlined_call_operand.vmem [shape: f32[1,32], index: 2, kind: input, shape index: {}]   ;;  %s1246_s3 = inlined_call_operand.vmem [shape: f32[32,16], index: 3, kind: input, shape index: {}]   ;;  %s1247_s4 = inlined_call_operand.vmem [shape: f32[1,16], index: 4, kind: input, shape index: {}]   ;;  %s1248_s5 = inlined_call_operand.vmem [shape: f32[16,128], index: 5, kind: input, shape index: {}]   ;;  %s1249_s6 = inlined_call_operand.vmem [shape: f32[1,128], index: 6, kind: input, shape index: {}]   ;;  %s1250_s7 = inlined_call_operand.hbm [shape: f32[8,128], index: 7, kind: output, shape index: {}]  }
   0x1   :  { %v913_v0 = vld [vmem:[%s1244_s1 + $0x38] sm:$0xff]  ;;  %v912_v3 = vld [vmem:[%s1244_s1 + $0x30] sm:$0xff]  ;;  %v911_v7 = vld [vmem:[%s1244_s1 + $0x28] sm:$0xff] }
   0x2   :  { %v921_v1 = vld [vmem:[%s1244_s1 + $0x78] sm:$0xff]  ;;  %508 = vmatpush.bf16.msra.mxu0 %v913_v0  ;;  %v920_v4 = vld [vmem:[%s1244_s1 + $0x70] sm:$0xff]  ;;  %v919_v8 = vld [vmem:[%s1244_s1 + $0x68] sm:$0xff] }
   0x3   :  { %v929_v2 = vld [vmem:[%s1244_s1 + $0xb8] sm:$0xff]  ;;  %521 = vmatpush.bf16.msra.mxu1 %v921_v1  ;;  %v928_v5 = vld [vmem:[%s1244_s1 + $0xb0] sm:$0xff]  ;;  %v927_v9 = vld [vmem:[%s1244_s1 + $0xa8] sm:$0xff] }
   0x4   :  { %534 = vmatpush.bf16.msra.mxu2 %v929_v2  ;;  %v937_v6 = vld [vmem:[%s1244_s1 + $0xf8] sm:$0xff]  ;;  %v936_v10 = vld [vmem:[%s1244_s1 + $0xf0] sm:$0xff]  ;;  %v910_v11 = vld [vmem:[%s1244_s1 + $0x20] sm:$0xff] }
   0x5   :  { %547 = vmatpush.bf16.msra.mxu3 %v937_v6  ;;  %v918_v12 = vld [vmem:[%s1244_s1 + $0x60] sm:$0xff]  ;;  %v935_v14 = vld [vmem:[%s1244_s1 + $0xe8] sm:$0xff]  ;;  %v909_v15 = vld [vmem:[%s1244_s1 + $0x18] sm:$0xff] }
   0x6   :  { %509 = vmatpush.bf16.msra.mxu0 %v912_v3  ;;  %v926_v13 = vld [vmem:[%s1244_s1 + $0xa0] sm:$0xff]  ;;  %v917_v16 = vld [vmem:[%s1244_s1 + $0x58] sm:$0xff] }
   0x7   :  { %522 = vmatpush.bf16.msra.mxu1 %v920_v4  ;;  %v925_v17 = vld [vmem:[%s1244_s1 + $0x98] sm:$0xff]  ;;  %v934_v18 = vld [vmem:[%s1244_s1 + $0xe0] sm:$0xff] }
   0x8   :  { %535 = vmatpush.bf16.msra.mxu2 %v928_v5 }
   0x9   :  { %548 = vmatpush.bf16.msra.mxu3 %v936_v10 }
   0xa   :  { %510 = vmatpush.bf16.msra.mxu0 %v911_v7 }
   0xb   :  { %523 = vmatpush.bf16.msra.mxu1 %v919_v8 }
   0xc   :  { %536 = vmatpush.bf16.msra.mxu2 %v927_v9 }
   0xd   :  { %549 = vmatpush.bf16.msra.mxu3 %v935_v14 }
   0xe   :  { %511 = vmatpush.bf16.msra.mxu0 %v910_v11 }
   0xf   :  { %524 = vmatpush.bf16.msra.mxu1 %v918_v12 }
  0x10   :  { %537 = vmatpush.bf16.msra.mxu2 %v926_v13 }
  0x11   :  { %12 = vsyncpa [#allocation3], 0  ;;  %v908_v19 = vld [vmem:[%s1244_s1 + $0x10] sm:$0xff]  ;;  %550 = vmatpush.bf16.msra.mxu3 %v934_v18  ;;  %v933_v22 = vld [vmem:[%s1244_s1 + $0xd8] sm:$0xff]  ;;  %vm608_vm0 = vcmask 261120   ;;  %vm639_vm1 = vcmask 130048  }
  0x12   :  { %512 = vmatpush.bf16.msra.mxu0 %v909_v15  ;;  %v916_v20 = vld [vmem:[%s1244_s1 + $0x50] sm:$0xff]  ;;  %v907_v23 = vld [vmem:[%s1244_s1 + $0x8] sm:$0xff]  ;;  %v27_v25 = vld [vmem:[%s1243_s0] sm:$0xff]  ;;  %s992_s20 = smov [#allocation2]  }
  0x13   :  { %525 = vmatpush.bf16.msra.mxu1 %v917_v16  ;;  %v924_v21 = vld [vmem:[%s1244_s1 + $0x90] sm:$0xff]  ;;  %v915_v24 = vld [vmem:[%s1244_s1 + $0x48] sm:$0xff]  ;;  %v151_v29 = vunpack.c.l.b16 %v27_v25  ;;  %v906_v30 = vld [vmem:[%s1244_s1] sm:$0xff]  ;;  %v152_v33 = vunpack.c.h.b16 %v27_v25  ;;  %s669_s21 = sshll.u32 %s992_s20, 4  ;;  %s670_s21 = int_to_ptr.vmem [resolvable:$true] %s669_s21 }
  0x14   :  { %538 = vmatpush.bf16.msra.mxu2 %v925_v17  ;;  %v923_v26 = vld [vmem:[%s1244_s1 + $0x88] sm:$0xff]  ;;  %v932_v27 = vld [vmem:[%s1244_s1 + $0xd0] sm:$0xff]  ;;  %v914_v31 = vld [vmem:[%s1244_s1 + $0x40] sm:$0xff] }
  0x15   :  { %551 = vmatpush.bf16.msra.mxu3 %v933_v22  ;;  %v28_v28 = vld [vmem:[%s1243_s0 + $0x8] sm:$0xff]  ;;  %v922_v34 = vld [vmem:[%s1244_s1 + $0x80] sm:$0xff]  ;;  %v945_v35 = vld [vmem:[%s1244_s1 + $0x138] sm:$0xff]  ;;  %v158_v38 = vpack.c.b16 %v151_v29, %v151_v29  ;;  %v159_v41 = vpack.c.b16 %v152_v33, %v152_v33 }
  0x16   :  { %513 = vmatpush.bf16.msra.mxu0 %v908_v19  ;;  %v153_v32 = vunpack.c.l.b16 %v28_v28  ;;  %v953_v36 = vld [vmem:[%s1244_s1 + $0x178] sm:$0xff]  ;;  %v931_v39 = vld [vmem:[%s1244_s1 + $0xc8] sm:$0xff]  ;;  %v944_v42 = vld [vmem:[%s1244_s1 + $0x130] sm:$0xff]  ;;  %v154_v46 = vunpack.c.h.b16 %v28_v28 }
  0x17   :  { %526 = vmatpush.bf16.msra.mxu1 %v916_v20  ;;  %v961_v37 = vld [vmem:[%s1244_s1 + $0x1b8] sm:$0xff]  ;;  %v952_v43 = vld [vmem:[%s1244_s1 + $0x170] sm:$0xff]  ;;  %v930_v45 = vld [vmem:[%s1244_s1 + $0xc0] sm:$0xff] }
  0x18   :  { %539 = vmatpush.bf16.msra.mxu2 %v924_v21  ;;  %v160_v40 = vpack.c.b16 %v153_v32, %v153_v32  ;;  %v960_v44 = vld [vmem:[%s1244_s1 + $0x1b0] sm:$0xff]  ;;  %v943_v47 = vld [vmem:[%s1244_s1 + $0x128] sm:$0xff]  ;;  %v161_v50 = vpack.c.b16 %v154_v46, %v154_v46  ;;  %v942_v51 = vld [vmem:[%s1244_s1 + $0x120] sm:$0xff] }
  0x19   :  { %552 = vmatpush.bf16.msra.mxu3 %v932_v27  ;;  %v951_v48 = vld [vmem:[%s1244_s1 + $0x168] sm:$0xff]  ;;  %v950_v52 = vld [vmem:[%s1244_s1 + $0x160] sm:$0xff]  ;;  %v941_v54 = vld [vmem:[%s1244_s1 + $0x118] sm:$0xff] }
  0x1a   :  { %514 = vmatpush.bf16.msra.mxu0 %v907_v23  ;;  %v959_v49 = vld [vmem:[%s1244_s1 + $0x1a8] sm:$0xff]  ;;  %v958_v53 = vld [vmem:[%s1244_s1 + $0x1a0] sm:$0xff]  ;;  %v949_v55 = vld [vmem:[%s1244_s1 + $0x158] sm:$0xff] }
  0x1b   :  { %527 = vmatpush.bf16.msra.mxu1 %v915_v24  ;;  %v957_v56 = vld [vmem:[%s1244_s1 + $0x198] sm:$0xff]  ;;  %v940_v57 = vld [vmem:[%s1244_s1 + $0x110] sm:$0xff]  ;;  %v939_v60 = vld [vmem:[%s1244_s1 + $0x108] sm:$0xff] }
  0x1c   :  { %540 = vmatpush.bf16.msra.mxu2 %v923_v26  ;;  %v948_v58 = vld [vmem:[%s1244_s1 + $0x150] sm:$0xff]  ;;  %v947_v62 = vld [vmem:[%s1244_s1 + $0x148] sm:$0xff]  ;;  %v30_v0 = vld [vmem:[%s1243_s0 + $0x18] sm:$0xf] }
  0x1d   :  { %553 = vmatpush.bf16.msra.mxu3 %v931_v39  ;;  %v956_v59 = vld [vmem:[%s1244_s1 + $0x190] sm:$0xff]  ;;  %v955_v63 = vld [vmem:[%s1244_s1 + $0x188] sm:$0xff]  ;;  %v938_v2 = vld [vmem:[%s1244_s1 + $0x100] sm:$0xff]  ;;  %v157_v4 = vunpack.c.l.b16 %v30_v0 }
  0x1e   :  { %515 = vmatpush.bf16.msra.mxu0 %v906_v30  ;;  %v29_v61 = vld [vmem:[%s1243_s0 + $0x10] sm:$0xff]  ;;  %v946_v5 = vld [vmem:[%s1244_s1 + $0x140] sm:$0xff]  ;;  %v603_v10 = vld [vmem:[%s1246_s3 + $0x18] sm:$0xff] }
  0x1f   :  { %528 = vmatpush.bf16.msra.mxu1 %v914_v31  ;;  %v155_v1 = vunpack.c.l.b16 %v29_v61  ;;  %v156_v3 = vunpack.c.h.b16 %v29_v61  ;;  %v954_v6 = vld [vmem:[%s1244_s1 + $0x180] sm:$0xff]  ;;  %v164_v9 = vpack.c.b16 %v157_v4, %v157_v4  ;;  %v602_v11 = vld [vmem:[%s1246_s3 + $0x10] sm:$0xff]  ;;  %v601_v13 = vld [vmem:[%s1246_s3 + $0x8] sm:$0xff] }
  0x20   :  { %541 = vmatpush.bf16.msra.mxu2 %v922_v34  ;;  %v600_v16 = vld [vmem:[%s1246_s3] sm:$0xff]  ;;  %v634_v19 = vld [vmem:[%s1248_s5 + $0x8] sm:$0xff] }
  0x21   :  { %516 = vmatmul.bf16.vlgmr.msra.gmra.mxu0 %v158_v38  ;;  %554 = vmatpush.bf16.msra.mxu3 %v930_v45  ;;  %v162_v7 = vpack.c.b16 %v155_v1, %v155_v1  ;;  %v163_v8 = vpack.c.b16 %v156_v3, %v156_v3  ;;  %v963_v20 = vld [vmem:[%s1245_s2] ss:$0 sm:$0xff] }
  0x22   :  { %560 = vmatpush.bf16.msrb.mxu0 %v945_v35  ;;  %529 = vmatmul.bf16.vlgmr.msra.gmra.mxu1 %v159_v41  ;;  %v633_v38 = vld [vmem:[%s1248_s5] sm:$0xff]  ;;  %s671_s5 = sshll.u32 %s1250_s7, 4  ;;  %s672_s5 = int_to_ptr.hbm [resolvable:$true] %s671_s5 }
  0x23   :  { %573 = vmatpush.bf16.msrb.mxu1 %v953_v36  ;;  %542 = vmatmul.bf16.vlgmr.msra.gmra.mxu2 %v160_v40  ;;  %v964_v39 = vld [vmem:[%s1247_s4] ss:$0 sm:$0xff] }
  0x24   :  { %586 = vmatpush.bf16.msrb.mxu2 %v961_v37  ;;  %555 = vmatmul.bf16.vlgmr.msra.gmra.mxu3 %v161_v50 }
  0x25   :  { %624 = vmatpush.msrb.mxu3 %v603_v10 }
  0x26   :  { %561 = vmatpush.bf16.msrb.mxu0 %v944_v42 }
  0x27   :  { %574 = vmatpush.bf16.msrb.mxu1 %v952_v43  ;;  %625 = vmatpush.msrb.mxu3 %v602_v11  ;;  %v965_v43 = vld [vmem:[%s1249_s6] ss:$0 sm:$0xff] }
  0x28   :  { %587 = vmatpush.bf16.msrb.mxu2 %v960_v44 }
  0x29   :  { %626 = vmatpush.msrb.mxu3 %v601_v13 }
  0x2a   :  { %562 = vmatpush.bf16.msrb.mxu0 %v943_v47 }
  0x2b   :  { %575 = vmatpush.bf16.msrb.mxu1 %v951_v48  ;;  %627 = vmatpush.msrb.mxu3 %v600_v16 }
  0x2c   :  { %588 = vmatpush.bf16.msrb.mxu2 %v959_v49 }
  0x2d   :  { %657 = vmatpush.msra.mxu3 %v634_v19 }
  0x2e   :  { %563 = vmatpush.bf16.msrb.mxu0 %v942_v51 }
  0x2f   :  { %576 = vmatpush.bf16.msrb.mxu1 %v950_v52  ;;  %658 = vmatpush.msra.mxu3 %v633_v38 }
  0x30   :  { %589 = vmatpush.bf16.msrb.mxu2 %v958_v53 }
  0x32   :  { %564 = vmatpush.bf16.msrb.mxu0 %v941_v54 }
  0x33   :  { %577 = vmatpush.bf16.msrb.mxu1 %v949_v55 }
  0x34   :  { %590 = vmatpush.bf16.msrb.mxu2 %v957_v56 }
  0x36   :  { %565 = vmatpush.bf16.msrb.mxu0 %v940_v57 }
  0x37   :  { %578 = vmatpush.bf16.msrb.mxu1 %v948_v58 }
  0x38   :  { %591 = vmatpush.bf16.msrb.mxu2 %v956_v59 }
  0x3a   :  { %566 = vmatpush.bf16.msrb.mxu0 %v939_v60 }
  0x3b   :  { %579 = vmatpush.bf16.msrb.mxu1 %v947_v62 }
  0x3c   :  { %592 = vmatpush.bf16.msrb.mxu2 %v955_v63 }
  0x3e   :  { %567 = vmatpush.bf16.msrb.mxu0 %v938_v2 }
  0x3f   :  { %580 = vmatpush.bf16.msrb.mxu1 %v946_v5 }
  0x40   :  { %593 = vmatpush.bf16.msrb.mxu2 %v954_v6 }
  0x41   :  { %568 = vmatmul.bf16.vlgmr.msrb.gmra.mxu0 %v162_v7 }
  0x42   :  { %581 = vmatmul.bf16.vlgmr.msrb.gmra.mxu1 %v163_v8 }
  0x43   :  { %594 = vmatmul.bf16.vlgmr.msrb.gmra.mxu2 %v164_v9 }
  0x9e   :  { %v517_v12 = vpop.f32.mrf.mxu0 }
  0x9f   :  { %v530_v14 = vpop.f32.mrf.mxu1  ;;  %v518_v23 = vadd.f32 %v963_v20, %v517_v12 }
  0xa1   :  { %v531_v24 = vadd.f32 %v530_v14, %v518_v23 }
  0xa6   :  { %v543_v15 = vpop.f32.mrf.mxu2  ;;  %v519_v17 = vpop.f32.mrf.mxu0 }
  0xa7   :  { %v532_v18 = vpop.f32.mrf.mxu1  ;;  %v556_v21 = vpop.f32.mrf.mxu3  ;;  %v544_v26 = vadd.f32 %v543_v15, %v531_v24 }
  0xa9   :  { %v557_v27 = vadd.f32 %v556_v21, %v544_v26 }
  0xae   :  { %v545_v22 = vpop.f32.mrf.mxu2 }
  0xaf   :  { %v558_v25 = vpop.f32.mrf.mxu3 }
  0xbe   :  { %v569_v28 = vpop.f32.mrf.mxu0 }
  0xbf   :  { %v582_v29 = vpop.f32.mrf.mxu1  ;;  %v570_v30 = vadd.f32 %v569_v28, %v557_v27 }
  0xc1   :  { %v583_v31 = vadd.f32 %v582_v29, %v570_v30 }
  0xc6   :  { %v595_v32 = vpop.f32.mrf.mxu2  ;;  %v571_v34 = vpop.f32.mrf.mxu0 }
  0xc7   :  { %v596_v33 = vadd.f32 %v595_v32, %v583_v31  ;;  %v584_v35 = vpop.f32.mrf.mxu1 }
  0xc9   :  { %v599_v36 = vmax.f32 %v596_v33, 0.0 }
  0xcb   :  { %904 = vmatmul.msk.f32.vlgmr.msrb.gmra.mxu3 %vm608_vm0, %v599_v36 }
  0xce   :  { %v597_v37 = vpop.f32.mrf.mxu2 }
 0x14e   :  { %v629_v40 = vpop.f32.mrf.mxu3 }
 0x14f   :  { %v630_v41 = vadd.f32 %v964_v39, %v629_v40 }
 0x151   :  { %v632_v42 = vmax.f32 %v630_v41, 0.0 }
 0x153   :  { %905 = vmatmul.msk.f32.vlgmr.msra.gmra.mxu3 %vm639_vm1, %v632_v42 }
 0x1d6   :  { %v660_v44 = vpop.f32.mrf.mxu3 }
 0x1d7   :  { %v661_v45 = vadd.f32 %v965_v43, %v660_v44 }
 0x1d9   :  { %663 = vst [vmem:[#allocation2] sm:$0xff] %v661_v45 }
 0x1da   :  { %674 = dma.vmem_to_hbm [thread:$0]  %s670_s21, 128, %s672_s5, [#allocation3]  }
 0x1db   :  { %990 = dma.done.wait [#allocation3], 128  }
 0x1dc   :  { %991 = vsyncadd [#allocation3], 4294967168 }
 0x1dd   :  { %679 = vsyncpa [#allocation3], 1 }

</bundles_post_ra>
